<compile_context>
chip_gen: v7x
topology: tpu7x:2x2x1
jax: 0.10.0
libtpu: 0.0.40
codegen_flags: <defaults>
</compile_context>

<pallas_src>
import math
import jax
import jax.numpy as jnp
from jax import lax
from jax.experimental import pallas as pl
from jax.experimental.pallas import tpu as pltpu


def _pick_tile(n, target):
    """Largest tile <= target (multiple of 8) that divides n, else n itself.

    The fallback to the full dimension is required for correctness when no
    multiple-of-8 divisor exists (TPU block shapes must be 8-divisible or equal
    to the full extent)."""
    if n <= target:
        return n
    t = (target // 8) * 8
    while t >= 8:
        if n % t == 0:
            return t
        t -= 8
    return n


def _default_vmem_budget():
    """Generation-aware VMEM budget: ~3/4 of per-core VMEM (>=32 MiB)."""
    try:
        cap = int(pltpu.get_tpu_info().vmem_capacity_bytes)
    except Exception:
        cap = 64 * 1024 * 1024  # conservative fallback (safe on v7x's 64 MiB)
    return max(32 * 1024 * 1024, (cap * 3) // 4)


def _layernorm(x, gamma, beta, eps=1e-5):
    mu = jnp.mean(x, axis=-1, keepdims=True)
    xc = x - mu
    var = jnp.mean(xc * xc, axis=-1, keepdims=True)
    return xc * lax.rsqrt(var + eps) * gamma + beta


# ----------------------------------------------------------------------------
# Fused ExtraHeadAttention + residual + LayerNorm (+ optional MLP + LayerNorm)
# ----------------------------------------------------------------------------

def extra_head_attention_ln(q_res, kv, attn_p, ln_g, ln_b, *,
                            q_pe=None, k_pe=None,
                            num_heads, extra_heads=1,
                            add_residual=True, mlp=None,
                            q_tile_target=512, k_tile_target=2048,
                            compute_dtype=jnp.float32,
                            vmem_limit_bytes=None):
    """Computes:
         q = q_res (+ q_pe);  k = kv (+ k_pe);  v = kv
         y = LayerNorm(q_res * add_residual + ExtraHeadAttention(q, k, v))
         if mlp=(w1,b1,w2,b2,g3,b3):  y = LayerNorm3(y + MLP(y))
       Output has the shape/dtype of q_res.
    """
    B, Nq, C = q_res.shape
    _, Nk, _ = kv.shape
    internal = attn_p["wq"].shape[1]
    extra_ch = attn_p["wqe"].shape[1]
    assert internal % num_heads == 0
    c_per_head = internal // num_heads
    assert extra_ch == extra_heads * c_per_head
    H = num_heads + extra_heads
    D_all = internal + extra_ch
    scale = 1.0 / math.sqrt(c_per_head)

    cdt = jnp.dtype(compute_dtype)
    f32 = jnp.float32
    has_qpe = q_pe is not None
    has_kpe = k_pe is not None
    fuse_mlp = mlp is not None

    budget = int(vmem_limit_bytes) if vmem_limit_bytes is not None else _default_vmem_budget()

    TQ = _pick_tile(Nq, q_tile_target)
    # Cap the kv tile so its double-buffered stream (kv [+ k_pe], f32 inputs)
    # uses at most ~1/3 of the VMEM budget (rest: weights, q blocks, scratch).
    kv_streams = 2 if has_kpe else 1
    bytes_per_kv_row = C * 4 * 2 * kv_streams
    tk_cap = max(128, (budget // 3) // bytes_per_kv_row)
    TK = _pick_tile(Nk, min(k_tile_target, tk_cap))
    QT = Nq // TQ
    KT = Nk // TK
    use_flash = KT > 1

    dn = (((1,), (1,)), ((), ()))  # contract channel dims of q / k -> no transpose

    # ---- wrapper-side weight fusion (trace time, outside the kernel) ----
    # Q: concat standard + extra projections, fold softmax scale into W and b.
    wq_all = (jnp.concatenate([attn_p["wq"], attn_p["wqe"]], axis=1) * scale).astype(cdt)
    bq_all = jnp.concatenate([attn_p["bq"], attn_p["bqe"]], axis=1) * scale      # f32
    # K: bias dropped (adds a per-query-row constant that cancels in softmax).
    wk_all = jnp.concatenate([attn_p["wk"], attn_p["wke"]], axis=1).astype(cdt)
    # V: concat standard + extra.
    wv_all = jnp.concatenate([attn_p["wv"], attn_p["wve"]], axis=1).astype(cdt)
    bv_all = jnp.concatenate([attn_p["bv"], attn_p["bve"]], axis=1)              # f32
    # Output projection: stack wo / woe along the input dim; biases summed once.
    w_out = jnp.concatenate([attn_p["wo"], attn_p["woe"]], axis=0).astype(cdt)
    b_out = attn_p["bo"] + attn_p["boe"]                                         # f32

    if fuse_mlp:
        w1, b1, w2, b2, g3, b3 = mlp
        mlp_ops = (w1.astype(cdt), b1, w2.astype(cdt), b2, g3, b3)

    def kernel(*refs):
        it = iter(refs)
        q_res_ref = next(it)
        qpe_ref = next(it) if has_qpe else None
        kv_ref = next(it)
        kpe_ref = next(it) if has_kpe else None
        wq_r, bq_r, wk_r, wv_r, bv_r, wo_r, bo_r, g_r, beta_r = [next(it) for _ in range(9)]
        if fuse_mlp:
            w1_r, b1_r, w2_r, b2_r, g3_r, b3_r = [next(it) for _ in range(6)]
        out_ref = next(it)
        if use_flash:
            qall_scr = next(it)
            m_scr = next(it)
            l_scr = next(it)
            acc_scr = next(it)

        def project_q():
            qx = q_res_ref[0].astype(f32)
            if has_qpe:
                qx = qx + qpe_ref[0].astype(f32)
            q_all = jnp.dot(qx.astype(cdt), wq_r[...],
                            preferred_element_type=f32) + bq_r[...].astype(f32)
            return q_all.astype(cdt)                      # [TQ, D_all], scale folded in

        def project_kv():
            kv_f = kv_ref[0].astype(f32)
            kx = kv_f + kpe_ref[0].astype(f32) if has_kpe else kv_f
            k_all = jnp.dot(kx.astype(cdt), wk_r[...],
                            preferred_element_type=f32)   # no bias (cancels in softmax)
            v_all = jnp.dot(kv_f.astype(cdt), wv_r[...],
                            preferred_element_type=f32) + bv_r[...].astype(f32)
            return k_all.astype(cdt), v_all.astype(cdt)   # [TK, D_all] each

        def out_projection(head_outs):
            # Single matmul against the stacked [D_all, C] output weight.
            concat = jnp.concatenate(head_outs, axis=-1).astype(cdt)   # [TQ, D_all]
            return jnp.dot(concat, wo_r[...],
                           preferred_element_type=f32) + bo_r[...].astype(f32)

        def epilogue(attn_out):
            y = attn_out
            if add_residual:
                y = q_res_ref[0].astype(f32) + y
            y = _layernorm(y, g_r[...].astype(f32), beta_r[...].astype(f32))
            if fuse_mlp:
                h1 = jnp.dot(y.astype(cdt), w1_r[...],
                             preferred_element_type=f32) + b1_r[...].astype(f32)
                h1 = jnp.maximum(h1, 0.0)
                y2 = jnp.dot(h1.astype(cdt), w2_r[...],
                             preferred_element_type=f32) + b2_r[...].astype(f32)
                y = _layernorm(y + y2, g3_r[...].astype(f32), b3_r[...].astype(f32))
            out_ref[0] = y.astype(out_ref.dtype)

        if not use_flash:
            # Single kv tile: plain softmax per head, then one fused out-projection.
            q_all = project_q()
            k_all, v_all = project_kv()
            head_outs = []
            for h in range(H):
                sl = slice(h * c_per_head, (h + 1) * c_per_head)
                s = lax.dot_general(q_all[:, sl], k_all[:, sl], dn,
                                    preferred_element_type=f32)
                s = s - jnp.max(s, axis=-1, keepdims=True)
                p = jnp.exp(s)
                p = p / jnp.sum(p, axis=-1, keepdims=True)
                head_outs.append(jnp.dot(p.astype(cdt), v_all[:, sl],
                                         preferred_element_type=f32))
            epilogue(out_projection(head_outs))
        else:
            # Flash-style online softmax over the kv (image-token) stream.
            kt = pl.program_id(2)

            @pl.when(kt == 0)
            def _init():
                # Q projection hoisted out of the kv loop: computed once per q tile.
                qall_scr[...] = project_q()
                m_scr[...] = jnp.full(m_scr.shape, -jnp.inf, dtype=f32)
                l_scr[...] = jnp.zeros(l_scr.shape, dtype=f32)
                acc_scr[...] = jnp.zeros(acc_scr.shape, dtype=f32)

            k_all, v_all = project_kv()
            for h in range(H):
                sl = slice(h * c_per_head, (h + 1) * c_per_head)
                s = lax.dot_general(qall_scr[:, sl], k_all[:, sl], dn,
                                    preferred_element_type=f32)          # [TQ, TK]
                m_prev = m_scr[h]
                m_new = jnp.maximum(m_prev, jnp.max(s, axis=-1, keepdims=True))
                alpha = jnp.exp(m_prev - m_new)
                p = jnp.exp(s - m_new)
                l_scr[h] = alpha * l_scr[h] + jnp.sum(p, axis=-1, keepdims=True)
                acc_scr[h] = alpha * acc_scr[h] + jnp.dot(
                    p.astype(cdt), v_all[:, sl], preferred_element_type=f32)
                m_scr[h] = m_new

            @pl.when(kt == KT - 1)
            def _finalize():
                # Exact reciprocal: finalize runs once per q tile.
                head_outs = [acc_scr[h] / l_scr[h] for h in range(H)]
                epilogue(out_projection(head_outs))

    # ---------------- operands & specs ----------------
    q_spec = pl.BlockSpec((1, TQ, C), lambda b, qt, kt: (b, qt, 0))
    kv_spec = pl.BlockSpec((1, TK, C), lambda b, qt, kt: (b, kt, 0))

    inputs, in_specs = [q_res], [q_spec]
    if has_qpe:
        inputs.append(q_pe)
        in_specs.append(q_spec)
    inputs.append(kv)
    in_specs.append(kv_spec)
    if has_kpe:
        inputs.append(k_pe)
        in_specs.append(kv_spec)

    def _const_spec(arr):
        return pl.BlockSpec(arr.shape, lambda b, qt, kt, nd=arr.ndim: (0,) * nd)

    const_ops = [wq_all, bq_all, wk_all, wv_all, bv_all, w_out, b_out, ln_g, ln_b]
    if fuse_mlp:
        const_ops.extend(mlp_ops)
    for w in const_ops:
        inputs.append(w)
        in_specs.append(_const_spec(w))

    scratch_shapes = []
    if use_flash:
        scratch_shapes = [
            pltpu.VMEM((TQ, D_all), cdt),                    # hoisted Q projection
            pltpu.VMEM((H, TQ, 1), jnp.float32),             # running max
            pltpu.VMEM((H, TQ, 1), jnp.float32),             # running denom
            pltpu.VMEM((H, TQ, c_per_head), jnp.float32),    # running numerator
        ]

    return pl.pallas_call(
        kernel,
        out_shape=jax.ShapeDtypeStruct((B, Nq, C), q_res.dtype),
        grid=(B, QT, KT),
        in_specs=in_specs,
        out_specs=pl.BlockSpec((1, TQ, C), lambda b, qt, kt: (b, qt, 0)),
        scratch_shapes=scratch_shapes,
        compiler_params=pltpu.CompilerParams(
            dimension_semantics=("parallel", "parallel", "arbitrary"),
            vmem_limit_bytes=int(budget)),
    )(*inputs)


# ----------------------------------------------------------------------------
# TwoWayAttentionBlock forward (3 fused pallas_calls)
# ----------------------------------------------------------------------------

def two_way_attention_block(queries, keys, query_pe, key_pe, params, *,
                            num_heads=2, extra_heads=1,
                            skip_first_layer_pe=False,
                            q_tile_target=512, k_tile_target=2048,
                            compute_dtype=jnp.float32,
                            vmem_limit_bytes=None):
    common = dict(num_heads=num_heads, extra_heads=extra_heads,
                  q_tile_target=q_tile_target, k_tile_target=k_tile_target,
                  compute_dtype=compute_dtype, vmem_limit_bytes=vmem_limit_bytes)

    # (1) self attention of sparse inputs  (+ LayerNorm1 fused)
    if skip_first_layer_pe:
        queries = extra_head_attention_ln(
            queries, queries, params["self_attn"],
            params["norm1_g"], params["norm1_b"],
            q_pe=None, k_pe=None, add_residual=False, **common)
    else:
        queries = extra_head_attention_ln(
            queries, queries, params["self_attn"],
            params["norm1_g"], params["norm1_b"],
            q_pe=query_pe, k_pe=query_pe, add_residual=True, **common)

    # (2)+(3) cross attention tokens -> image, fused with LN2 + MLP + LN3
    mlp = (params["mlp_w1"], params["mlp_b1"], params["mlp_w2"], params["mlp_b2"],
           params["norm3_g"], params["norm3_b"])
    queries = extra_head_attention_ln(
        queries, keys, params["cross_t2i"],
        params["norm2_g"], params["norm2_b"],
        q_pe=query_pe, k_pe=key_pe, add_residual=True, mlp=mlp, **common)

    # (4) cross attention image -> tokens (+ LayerNorm4 fused); q side = keys
    keys = extra_head_attention_ln(
        keys, queries, params["cross_i2t"],
        params["norm4_g"], params["norm4_b"],
        q_pe=key_pe, k_pe=query_pe, add_residual=True, **common)

    return queries, keys


# ----------------------------------------------------------------------------
# Deterministic parameter initialization
# ----------------------------------------------------------------------------

def _init_linear(key, fan_in, fan_out):
    kw, kb = jax.random.split(key)
    w = jax.random.normal(kw, (fan_in, fan_out), jnp.float32) * 0.05
    b = jax.random.normal(kb, (1, fan_out), jnp.float32) * 0.05
    return w, b


def init_extra_head_attention(key, embedding_dim, num_heads, downsample_rate=1,
                              extra_heads=1):
    internal = embedding_dim // downsample_rate
    assert internal % num_heads == 0
    c_per_head = internal // num_heads
    extra_ch = extra_heads * c_per_head
    ks = jax.random.split(key, 8)
    p = {}
    p["wq"], p["bq"] = _init_linear(ks[0], embedding_dim, internal)
    p["wk"], p["bk"] = _init_linear(ks[1], embedding_dim, internal)
    p["wv"], p["bv"] = _init_linear(ks[2], embedding_dim, internal)
    p["wo"], p["bo"] = _init_linear(ks[3], internal, embedding_dim)
    p["wqe"], p["bqe"] = _init_linear(ks[4], embedding_dim, extra_ch)
    p["wke"], p["bke"] = _init_linear(ks[5], embedding_dim, extra_ch)
    p["wve"], p["bve"] = _init_linear(ks[6], embedding_dim, extra_ch)
    p["woe"], p["boe"] = _init_linear(ks[7], extra_ch, embedding_dim)
    return p


def init_two_way_block(key, embedding_dim, num_heads, mlp_dim,
                       attention_downsample_rate=2, extra_heads=1):
    ks = jax.random.split(key, 5)
    params = {
        "self_attn": init_extra_head_attention(ks[0], embedding_dim, num_heads, 1, extra_heads),
        "cross_t2i": init_extra_head_attention(ks[1], embedding_dim, num_heads,
                                               attention_downsample_rate, extra_heads),
        "cross_i2t": init_extra_head_attention(ks[2], embedding_dim, num_heads,
                                               attention_downsample_rate, extra_heads),
    }
    params["mlp_w1"], params["mlp_b1"] = _init_linear(ks[3], embedding_dim, mlp_dim)
    params["mlp_w2"], params["mlp_b2"] = _init_linear(ks[4], mlp_dim, embedding_dim)
    for n in ("norm1", "norm2", "norm3", "norm4"):
        params[n + "_g"] = jnp.ones((1, embedding_dim), jnp.float32)
        params[n + "_b"] = jnp.zeros((1, embedding_dim), jnp.float32)
    return params


# ----------------------------------------------------------------------------
# Pure-JAX reference (for correctness checks)
# ----------------------------------------------------------------------------

def _ref_attention(q, k, v, p, num_heads, extra_heads):
    qp = q @ p["wq"] + p["bq"]
    kp = k @ p["wk"] + p["bk"]
    vp = v @ p["wv"] + p["bv"]
    qe = q @ p["wqe"] + p["bqe"]
    ke = k @ p["wke"] + p["bke"]
    ve = v @ p["wve"] + p["bve"]
    H = num_heads + extra_heads

    def split(x):
        b, n, c = x.shape
        return x.reshape(b, n, H, c // H).transpose(0, 2, 1, 3)

    qh = split(jnp.concatenate([qp, qe], -1))
    kh = split(jnp.concatenate([kp, ke], -1))
    vh = split(jnp.concatenate([vp, ve], -1))
    cph = qh.shape[-1]
    attn = jnp.einsum("bhqc,bhkc->bhqk", qh, kh) / math.sqrt(cph)
    attn = jax.nn.softmax(attn, axis=-1)
    out = jnp.einsum("bhqk,bhkc->bhqc", attn, vh)

    def recombine(x):
        b, h, n, c = x.shape
        return x.transpose(0, 2, 1, 3).reshape(b, n, h * c)

    origin = recombine(out[:, :num_heads]) @ p["wo"] + p["bo"]
    extra = recombine(out[:, num_heads:]) @ p["woe"] + p["boe"]
    return origin + extra


def _ref_ln(x, g, b):
    mu = jnp.mean(x, -1, keepdims=True)
    xc = x - mu
    var = jnp.mean(xc * xc, -1, keepdims=True)
    return xc / jnp.sqrt(var + 1e-5) * g + b


def _ref_block(queries, keys, query_pe, key_pe, P, num_heads, extra_heads,
               skip_first_layer_pe=False):
    if skip_first_layer_pe:
        attn_out = _ref_attention(queries, queries, queries, P["self_attn"],
                                  num_heads, extra_heads)
        queries = _ref_ln(attn_out, P["norm1_g"], P["norm1_b"])
    else:
        q = queries + query_pe
        attn_out = _ref_attention(q, q, queries, P["self_attn"], num_heads, extra_heads)
        queries = _ref_ln(queries + attn_out, P["norm1_g"], P["norm1_b"])
    q = queries + query_pe
    k = keys + key_pe
    attn_out = _ref_attention(q, k, keys, P["cross_t2i"], num_heads, extra_heads)
    queries = _ref_ln(queries + attn_out, P["norm2_g"], P["norm2_b"])
    mlp_out = jnp.maximum(queries @ P["mlp_w1"] + P["mlp_b1"], 0.0) @ P["mlp_w2"] + P["mlp_b2"]
    queries = _ref_ln(queries + mlp_out, P["norm3_g"], P["norm3_b"])
    q = queries + query_pe
    k = keys + key_pe
    attn_out = _ref_attention(k, q, queries, P["cross_i2t"], num_heads, extra_heads)
    keys = _ref_ln(keys + attn_out, P["norm4_g"], P["norm4_b"])
    return queries, keys


# ----------------------------------------------------------------------------

if __name__ == "__main__":
    NUM_HEADS, EXTRA_HEADS = 2, 1

    def run_case(B, Nq, Nk, C, mlp_dim, *, q_tile_target, k_tile_target,
                 compute_dtype, skip_first, atol, rtol, name):
        key = jax.random.PRNGKey(0)
        k0, k1, k2, k3, kp = jax.random.split(key, 5)
        queries = jax.random.normal(k0, (B, Nq, C), jnp.float32)
        keys = jax.random.normal(k1, (B, Nk, C), jnp.float32)
        query_pe = jax.random.normal(k2, (B, Nq, C), jnp.float32)
        key_pe = jax.random.normal(k3, (B, Nk, C), jnp.float32)
        params = init_two_way_block(kp, C, NUM_HEADS, mlp_dim,
                                    attention_downsample_rate=2,
                                    extra_heads=EXTRA_HEADS)

        out_q, out_k = two_way_attention_block(
            queries, keys, query_pe, key_pe, params,
            num_heads=NUM_HEADS, extra_heads=EXTRA_HEADS,
            skip_first_layer_pe=skip_first,
            q_tile_target=q_tile_target, k_tile_target=k_tile_target,
            compute_dtype=compute_dtype)
        jax.block_until_ready((out_q, out_k))

        ref_q, ref_k = _ref_block(queries, keys, query_pe, key_pe, params,
                                  NUM_HEADS, EXTRA_HEADS,
                                  skip_first_layer_pe=skip_first)
        assert jnp.allclose(out_q, ref_q, atol=atol, rtol=rtol), f"{name}: queries mismatch"
        assert jnp.allclose(out_k, ref_k, atol=atol, rtol=rtol), f"{name}: keys mismatch"

    # 1) small shapes, f32, single-tile path
    run_case(2, 8, 16, 32, 64, q_tile_target=512, k_tile_target=2048,
             compute_dtype=jnp.float32, skip_first=False,
             atol=1e-3, rtol=1e-3, name="small_f32")
    # 2) skip_first_layer_pe path (no PE, no residual on first attention)
    run_case(2, 8, 16, 32, 64, q_tile_target=512, k_tile_target=2048,
             compute_dtype=jnp.float32, skip_first=True,
             atol=1e-3, rtol=1e-3, name="skip_pe_f32")
    # 3) larger image-token stream with a small forced kv tile: exercises the
    #    flash-style kv tiling (tokens->image) and q-side tiling (image->tokens).
    run_case(2, 8, 512, 32, 64, q_tile_target=128, k_tile_target=128,
             compute_dtype=jnp.float32, skip_first=False,
             atol=1e-3, rtol=1e-3, name="tiled_f32")
    # 4) bf16-on-MXU path (softmax / LN statistics stay in f32).
    run_case(2, 8, 16, 32, 64, q_tile_target=512, k_tile_target=2048,
             compute_dtype=jnp.bfloat16, skip_first=False,
             atol=5e-2, rtol=5e-2, name="small_bf16")

    print("KERNEL_OK")
</pallas_src>

<mosaic_0001>
module attributes {stable_mosaic.version = 11 : i64} {
  func.func @kernel(%arg0: i32, %arg1: i32, %arg2: i32, %arg3: memref<1x8x32xf32, #tpu.memory_space<vmem>>, %arg4: memref<1x8x32xf32, #tpu.memory_space<vmem>>, %arg5: memref<1x8x32xf32, #tpu.memory_space<vmem>>, %arg6: memref<1x8x32xf32, #tpu.memory_space<vmem>>, %arg7: memref<32x48xf32, #tpu.memory_space<vmem>>, %arg8: memref<1x48xf32, #tpu.memory_space<vmem>>, %arg9: memref<32x48xf32, #tpu.memory_space<vmem>>, %arg10: memref<32x48xf32, #tpu.memory_space<vmem>>, %arg11: memref<1x48xf32, #tpu.memory_space<vmem>>, %arg12: memref<48x32xf32, #tpu.memory_space<vmem>>, %arg13: memref<1x32xf32, #tpu.memory_space<vmem>>, %arg14: memref<1x32xf32, #tpu.memory_space<vmem>>, %arg15: memref<1x32xf32, #tpu.memory_space<vmem>>, %arg16: memref<1x8x32xf32, #tpu.memory_space<vmem>>) attributes {dimension_semantics = [#tpu.dimension_semantics<parallel>, #tpu.dimension_semantics<parallel>, #tpu.dimension_semantics<arbitrary>], iteration_bounds = array<i64: 2, 1, 1>, scalar_prefetch = 0 : i64, scratch_operands = 0 : i64, tpu.core_type = #tpu.core_type<tc>, window_params = [{transform_indices = @transform_0, window_bounds = array<i64: 1, 8, 32>}, {transform_indices = @transform_1, window_bounds = array<i64: 1, 8, 32>}, {transform_indices = @transform_2, window_bounds = array<i64: 1, 8, 32>}, {transform_indices = @transform_3, window_bounds = array<i64: 1, 8, 32>}, {pipeline_mode = #tpu.pipeline_mode<synchronous>, transform_indices = @transform_4, window_bounds = array<i64: 32, 48>}, {pipeline_mode = #tpu.pipeline_mode<synchronous>, transform_indices = @transform_5, window_bounds = array<i64: 1, 48>}, {pipeline_mode = #tpu.pipeline_mode<synchronous>, transform_indices = @transform_6, window_bounds = array<i64: 32, 48>}, {pipeline_mode = #tpu.pipeline_mode<synchronous>, transform_indices = @transform_7, window_bounds = array<i64: 32, 48>}, {pipeline_mode = #tpu.pipeline_mode<synchronous>, transform_indices = @transform_8, window_bounds = array<i64: 1, 48>}, {pipeline_mode = #tpu.pipeline_mode<synchronous>, transform_indices = @transform_9, window_bounds = array<i64: 48, 32>}, {pipeline_mode = #tpu.pipeline_mode<synchronous>, transform_indices = @transform_10, window_bounds = array<i64: 1, 32>}, {pipeline_mode = #tpu.pipeline_mode<synchronous>, transform_indices = @transform_11, window_bounds = array<i64: 1, 32>}, {pipeline_mode = #tpu.pipeline_mode<synchronous>, transform_indices = @transform_12, window_bounds = array<i64: 1, 32>}, {transform_indices = @transform_13, window_bounds = array<i64: 1, 8, 32>}]} {
    %c0 = arith.constant 0 : index
    %c0_0 = arith.constant 0 : index
    %c0_1 = arith.constant 0 : index
    %0 = vector.load %arg3[%c0, %c0_0, %c0_1] : memref<1x8x32xf32, #tpu.memory_space<vmem>>, vector<1x8x32xf32>
    %1 = vector.shape_cast %0 : vector<1x8x32xf32> to vector<8x32xf32>
    %c0_2 = arith.constant 0 : index
    %c0_3 = arith.constant 0 : index
    %c0_4 = arith.constant 0 : index
    %2 = vector.load %arg4[%c0_2, %c0_3, %c0_4] : memref<1x8x32xf32, #tpu.memory_space<vmem>>, vector<1x8x32xf32>
    %3 = vector.shape_cast %2 : vector<1x8x32xf32> to vector<8x32xf32>
    %4 = arith.addf %1, %3 : vector<8x32xf32>
    %c0_5 = arith.constant 0 : index
    %c0_6 = arith.constant 0 : index
    %5 = vector.load %arg7[%c0_5, %c0_6] : memref<32x48xf32, #tpu.memory_space<vmem>>, vector<32x48xf32>
    %cst = arith.constant dense<0.000000e+00> : vector<8x48xf32>
    %6 = tpu.matmul %4, %5, %cst {dimension_numbers = #tpu.dot_dimension_numbers<[1], [0], [0], [1], [0, 0, 1, 1], [], []>} : vector<8x32xf32>, vector<32x48xf32>, vector<8x48xf32> -> vector<8x48xf32>
    %c0_7 = arith.constant 0 : index
    %c0_8 = arith.constant 0 : index
    %7 = vector.load %arg8[%c0_7, %c0_8] : memref<1x48xf32, #tpu.memory_space<vmem>>, vector<1x48xf32>
    %8 = vector.broadcast %7 : vector<1x48xf32> to vector<8x48xf32>
    %9 = arith.addf %6, %8 : vector<8x48xf32>
    %c0_9 = arith.constant 0 : index
    %c0_10 = arith.constant 0 : index
    %c0_11 = arith.constant 0 : index
    %10 = vector.load %arg5[%c0_9, %c0_10, %c0_11] : memref<1x8x32xf32, #tpu.memory_space<vmem>>, vector<1x8x32xf32>
    %11 = vector.shape_cast %10 : vector<1x8x32xf32> to vector<8x32xf32>
    %c0_12 = arith.constant 0 : index
    %c0_13 = arith.constant 0 : index
    %c0_14 = arith.constant 0 : index
    %12 = vector.load %arg6[%c0_12, %c0_13, %c0_14] : memref<1x8x32xf32, #tpu.memory_space<vmem>>, vector<1x8x32xf32>
    %13 = vector.shape_cast %12 : vector<1x8x32xf32> to vector<8x32xf32>
    %14 = arith.addf %11, %13 : vector<8x32xf32>
    %c0_15 = arith.constant 0 : index
    %c0_16 = arith.constant 0 : index
    %15 = vector.load %arg9[%c0_15, %c0_16] : memref<32x48xf32, #tpu.memory_space<vmem>>, vector<32x48xf32>
    %cst_17 = arith.constant dense<0.000000e+00> : vector<8x48xf32>
    %16 = tpu.matmul %14, %15, %cst_17 {dimension_numbers = #tpu.dot_dimension_numbers<[1], [0], [0], [1], [0, 0, 1, 1], [], []>} : vector<8x32xf32>, vector<32x48xf32>, vector<8x48xf32> -> vector<8x48xf32>
    %c0_18 = arith.constant 0 : index
    %c0_19 = arith.constant 0 : index
    %17 = vector.load %arg10[%c0_18, %c0_19] : memref<32x48xf32, #tpu.memory_space<vmem>>, vector<32x48xf32>
    %cst_20 = arith.constant dense<0.000000e+00> : vector<8x48xf32>
    %18 = tpu.matmul %11, %17, %cst_20 {dimension_numbers = #tpu.dot_dimension_numbers<[1], [0], [0], [1], [0, 0, 1, 1], [], []>} : vector<8x32xf32>, vector<32x48xf32>, vector<8x48xf32> -> vector<8x48xf32>
    %c0_21 = arith.constant 0 : index
    %c0_22 = arith.constant 0 : index
    %19 = vector.load %arg11[%c0_21, %c0_22] : memref<1x48xf32, #tpu.memory_space<vmem>>, vector<1x48xf32>
    %20 = vector.broadcast %19 : vector<1x48xf32> to vector<8x48xf32>
    %21 = arith.addf %18, %20 : vector<8x48xf32>
    %22 = vector.extract_strided_slice %9 {offsets = [0, 0], sizes = [8, 16], strides = [1, 1]} : vector<8x48xf32> to vector<8x16xf32>
    %23 = vector.extract_strided_slice %16 {offsets = [0, 0], sizes = [8, 16], strides = [1, 1]} : vector<8x48xf32> to vector<8x16xf32>
    %cst_23 = arith.constant dense<0.000000e+00> : vector<8x8xf32>
    %24 = tpu.matmul %22, %23, %cst_23 {dimension_numbers = #tpu.dot_dimension_numbers<[1], [1], [0], [0], [0, 0, 1, 0], [], []>} : vector<8x16xf32>, vector<8x16xf32>, vector<8x8xf32> -> vector<8x8xf32>
    %cst_24 = arith.constant dense<0xFF800000> : vector<8xf32>
    %25 = vector.multi_reduction <maximumf>, %24, %cst_24 [1] : vector<8x8xf32> to vector<8xf32>
    %26 = vector.shape_cast %25 : vector<8xf32> to vector<8x1xf32>
    %27 = vector.broadcast %26 : vector<8x1xf32> to vector<8x8xf32>
    %28 = arith.subf %24, %27 : vector<8x8xf32>
    %29 = math.exp %28 : vector<8x8xf32>
    %cst_25 = arith.constant dense<0.000000e+00> : vector<8xf32>
    %30 = vector.multi_reduction <add>, %29, %cst_25 [1] : vector<8x8xf32> to vector<8xf32>
    %31 = vector.shape_cast %30 : vector<8xf32> to vector<8x1xf32>
    %32 = vector.broadcast %31 : vector<8x1xf32> to vector<8x8xf32>
    %33 = arith.divf %29, %32 : vector<8x8xf32>
    %34 = vector.extract_strided_slice %21 {offsets = [0, 0], sizes = [8, 16], strides = [1, 1]} : vector<8x48xf32> to vector<8x16xf32>
    %cst_26 = arith.constant dense<0.000000e+00> : vector<8x16xf32>
    %35 = tpu.matmul %33, %34, %cst_26 {dimension_numbers = #tpu.dot_dimension_numbers<[1], [0], [0], [1], [0, 0, 1, 1], [], []>} : vector<8x8xf32>, vector<8x16xf32>, vector<8x16xf32> -> vector<8x16xf32>
    %36 = vector.extract_strided_slice %9 {offsets = [0, 16], sizes = [8, 16], strides = [1, 1]} : vector<8x48xf32> to vector<8x16xf32>
    %37 = vector.extract_strided_slice %16 {offsets = [0, 16], sizes = [8, 16], strides = [1, 1]} : vector<8x48xf32> to vector<8x16xf32>
    %cst_27 = arith.constant dense<0.000000e+00> : vector<8x8xf32>
    %38 = tpu.matmul %36, %37, %cst_27 {dimension_numbers = #tpu.dot_dimension_numbers<[1], [1], [0], [0], [0, 0, 1, 0], [], []>} : vector<8x16xf32>, vector<8x16xf32>, vector<8x8xf32> -> vector<8x8xf32>
    %cst_28 = arith.constant dense<0xFF800000> : vector<8xf32>
    %39 = vector.multi_reduction <maximumf>, %38, %cst_28 [1] : vector<8x8xf32> to vector<8xf32>
    %40 = vector.shape_cast %39 : vector<8xf32> to vector<8x1xf32>
    %41 = vector.broadcast %40 : vector<8x1xf32> to vector<8x8xf32>
    %42 = arith.subf %38, %41 : vector<8x8xf32>
    %43 = math.exp %42 : vector<8x8xf32>
    %cst_29 = arith.constant dense<0.000000e+00> : vector<8xf32>
    %44 = vector.multi_reduction <add>, %43, %cst_29 [1] : vector<8x8xf32> to vector<8xf32>
    %45 = vector.shape_cast %44 : vector<8xf32> to vector<8x1xf32>
    %46 = vector.broadcast %45 : vector<8x1xf32> to vector<8x8xf32>
    %47 = arith.divf %43, %46 : vector<8x8xf32>
    %48 = vector.extract_strided_slice %21 {offsets = [0, 16], sizes = [8, 16], strides = [1, 1]} : vector<8x48xf32> to vector<8x16xf32>
    %cst_30 = arith.constant dense<0.000000e+00> : vector<8x16xf32>
    %49 = tpu.matmul %47, %48, %cst_30 {dimension_numbers = #tpu.dot_dimension_numbers<[1], [0], [0], [1], [0, 0, 1, 1], [], []>} : vector<8x8xf32>, vector<8x16xf32>, vector<8x16xf32> -> vector<8x16xf32>
    %50 = vector.extract_strided_slice %9 {offsets = [0, 32], sizes = [8, 16], strides = [1, 1]} : vector<8x48xf32> to vector<8x16xf32>
    %51 = vector.extract_strided_slice %16 {offsets = [0, 32], sizes = [8, 16], strides = [1, 1]} : vector<8x48xf32> to vector<8x16xf32>
    %cst_31 = arith.constant dense<0.000000e+00> : vector<8x8xf32>
    %52 = tpu.matmul %50, %51, %cst_31 {dimension_numbers = #tpu.dot_dimension_numbers<[1], [1], [0], [0], [0, 0, 1, 0], [], []>} : vector<8x16xf32>, vector<8x16xf32>, vector<8x8xf32> -> vector<8x8xf32>
    %cst_32 = arith.constant dense<0xFF800000> : vector<8xf32>
    %53 = vector.multi_reduction <maximumf>, %52, %cst_32 [1] : vector<8x8xf32> to vector<8xf32>
    %54 = vector.shape_cast %53 : vector<8xf32> to vector<8x1xf32>
    %55 = vector.broadcast %54 : vector<8x1xf32> to vector<8x8xf32>
    %56 = arith.subf %52, %55 : vector<8x8xf32>
    %57 = math.exp %56 : vector<8x8xf32>
    %cst_33 = arith.constant dense<0.000000e+00> : vector<8xf32>
    %58 = vector.multi_reduction <add>, %57, %cst_33 [1] : vector<8x8xf32> to vector<8xf32>
    %59 = vector.shape_cast %58 : vector<8xf32> to vector<8x1xf32>
    %60 = vector.broadcast %59 : vector<8x1xf32> to vector<8x8xf32>
    %61 = arith.divf %57, %60 : vector<8x8xf32>
    %62 = vector.extract_strided_slice %21 {offsets = [0, 32], sizes = [8, 16], strides = [1, 1]} : vector<8x48xf32> to vector<8x16xf32>
    %cst_34 = arith.constant dense<0.000000e+00> : vector<8x16xf32>
    %63 = tpu.matmul %61, %62, %cst_34 {dimension_numbers = #tpu.dot_dimension_numbers<[1], [0], [0], [1], [0, 0, 1, 1], [], []>} : vector<8x8xf32>, vector<8x16xf32>, vector<8x16xf32> -> vector<8x16xf32>
    %64 = tpu.concatenate %35, %49, %63 in 1 : vector<8x16xf32>, vector<8x16xf32>, vector<8x16xf32> -> vector<8x48xf32>
    %c0_35 = arith.constant 0 : index
    %c0_36 = arith.constant 0 : index
    %65 = vector.load %arg12[%c0_35, %c0_36] : memref<48x32xf32, #tpu.memory_space<vmem>>, vector<48x32xf32>
    %cst_37 = arith.constant dense<0.000000e+00> : vector<8x32xf32>
    %66 = tpu.matmul %64, %65, %cst_37 {dimension_numbers = #tpu.dot_dimension_numbers<[1], [0], [0], [1], [0, 0, 1, 1], [], []>} : vector<8x48xf32>, vector<48x32xf32>, vector<8x32xf32> -> vector<8x32xf32>
    %c0_38 = arith.constant 0 : index
    %c0_39 = arith.constant 0 : index
    %67 = vector.load %arg13[%c0_38, %c0_39] : memref<1x32xf32, #tpu.memory_space<vmem>>, vector<1x32xf32>
    %68 = vector.broadcast %67 : vector<1x32xf32> to vector<8x32xf32>
    %69 = arith.addf %66, %68 : vector<8x32xf32>
    %c0_40 = arith.constant 0 : index
    %c0_41 = arith.constant 0 : index
    %c0_42 = arith.constant 0 : index
    %70 = vector.load %arg3[%c0_40, %c0_41, %c0_42] : memref<1x8x32xf32, #tpu.memory_space<vmem>>, vector<1x8x32xf32>
    %71 = vector.shape_cast %70 : vector<1x8x32xf32> to vector<8x32xf32>
    %72 = arith.addf %71, %69 : vector<8x32xf32>
    %c0_43 = arith.constant 0 : index
    %c0_44 = arith.constant 0 : index
    %73 = vector.load %arg14[%c0_43, %c0_44] : memref<1x32xf32, #tpu.memory_space<vmem>>, vector<1x32xf32>
    %c0_45 = arith.constant 0 : index
    %c0_46 = arith.constant 0 : index
    %74 = vector.load %arg15[%c0_45, %c0_46] : memref<1x32xf32, #tpu.memory_space<vmem>>, vector<1x32xf32>
    %cst_47 = arith.constant dense<0.000000e+00> : vector<8xf32>
    %75 = vector.multi_reduction <add>, %72, %cst_47 [1] : vector<8x32xf32> to vector<8xf32>
    %76 = vector.shape_cast %75 : vector<8xf32> to vector<8x1xf32>
    %cst_48 = arith.constant 3.200000e+01 : f32
    %77 = vector.broadcast %cst_48 : f32 to vector<8x1xf32>
    %78 = arith.divf %76, %77 : vector<8x1xf32>
    %79 = vector.broadcast %78 : vector<8x1xf32> to vector<8x32xf32>
    %80 = arith.subf %72, %79 : vector<8x32xf32>
    %81 = arith.mulf %80, %80 : vector<8x32xf32>
    %cst_49 = arith.constant dense<0.000000e+00> : vector<8xf32>
    %82 = vector.multi_reduction <add>, %81, %cst_49 [1] : vector<8x32xf32> to vector<8xf32>
    %83 = vector.shape_cast %82 : vector<8xf32> to vector<8x1xf32>
    %cst_50 = arith.constant 3.200000e+01 : f32
    %84 = vector.broadcast %cst_50 : f32 to vector<8x1xf32>
    %85 = arith.divf %83, %84 : vector<8x1xf32>
    %cst_51 = arith.constant 9.99999974E-6 : f32
    %86 = vector.broadcast %cst_51 : f32 to vector<8x1xf32>
    %87 = arith.addf %85, %86 : vector<8x1xf32>
    %88 = math.rsqrt %87 : vector<8x1xf32>
    %89 = vector.broadcast %88 : vector<8x1xf32> to vector<8x32xf32>
    %90 = arith.mulf %80, %89 : vector<8x32xf32>
    %91 = vector.broadcast %73 : vector<1x32xf32> to vector<8x32xf32>
    %92 = arith.mulf %90, %91 : vector<8x32xf32>
    %93 = vector.broadcast %74 : vector<1x32xf32> to vector<8x32xf32>
    %94 = arith.addf %92, %93 : vector<8x32xf32>
    %c0_52 = arith.constant 0 : index
    %c0_53 = arith.constant 0 : index
    %c0_54 = arith.constant 0 : index
    %95 = vector.load %arg16[%c0_52, %c0_53, %c0_54] : memref<1x8x32xf32, #tpu.memory_space<vmem>>, vector<1x8x32xf32>
    %96 = vector.shape_cast %95 : vector<1x8x32xf32> to vector<8x32xf32>
    %97 = vector.shape_cast %94 : vector<8x32xf32> to vector<1x8x32xf32>
    tpu.vector_store %arg16[%c0_52, %c0_53, %c0_54], %97 {strides = array<i32>} : memref<1x8x32xf32, #tpu.memory_space<vmem>>, vector<1x8x32xf32>,
    return
  }
  func.func @transform_0(%arg0: i32, %arg1: i32, %arg2: i32) -> (i32, i32, i32) {
    %c0_i32 = arith.constant 0 : i32
    %c0_i32_0 = arith.constant 0 : i32
    return %arg0, %arg1, %c0_i32 : i32, i32, i32
  }
  func.func @transform_1(%arg0: i32, %arg1: i32, %arg2: i32) -> (i32, i32, i32) {
    %c0_i32 = arith.constant 0 : i32
    %c0_i32_0 = arith.constant 0 : i32
    return %arg0, %arg1, %c0_i32 : i32, i32, i32
  }
  func.func @transform_2(%arg0: i32, %arg1: i32, %arg2: i32) -> (i32, i32, i32) {
    %c0_i32 = arith.constant 0 : i32
    %c0_i32_0 = arith.constant 0 : i32
    return %arg0, %arg2, %c0_i32 : i32, i32, i32
  }
  func.func @transform_3(%arg0: i32, %arg1: i32, %arg2: i32) -> (i32, i32, i32) {
    %c0_i32 = arith.constant 0 : i32
    %c0_i32_0 = arith.constant 0 : i32
    return %arg0, %arg2, %c0_i32 : i32, i32, i32
  }
  func.func @transform_4(%arg0: i32, %arg1: i32, %arg2: i32) -> (i32, i32) {
    %c0_i32 = arith.constant 0 : i32
    %c0_i32_0 = arith.constant 0 : i32
    %c0_i32_1 = arith.constant 0 : i32
    return %c0_i32, %c0_i32_0 : i32, i32
  }
  func.func @transform_5(%arg0: i32, %arg1: i32, %arg2: i32) -> (i32, i32) {
    %c0_i32 = arith.constant 0 : i32
    %c0_i32_0 = arith.constant 0 : i32
    %c0_i32_1 = arith.constant 0 : i32
    return %c0_i32, %c0_i32_0 : i32, i32
  }
  func.func @transform_6(%arg0: i32, %arg1: i32, %arg2: i32) -> (i32, i32) {
    %c0_i32 = arith.constant 0 : i32
    %c0_i32_0 = arith.constant 0 : i32
    %c0_i32_1 = arith.constant 0 : i32
    return %c0_i32, %c0_i32_0 : i32, i32
  }
  func.func @transform_7(%arg0: i32, %arg1: i32, %arg2: i32) -> (i32, i32) {
    %c0_i32 = arith.constant 0 : i32
    %c0_i32_0 = arith.constant 0 : i32
    %c0_i32_1 = arith.constant 0 : i32
    return %c0_i32, %c0_i32_0 : i32, i32
  }
  func.func @transform_8(%arg0: i32, %arg1: i32, %arg2: i32) -> (i32, i32) {
    %c0_i32 = arith.constant 0 : i32
    %c0_i32_0 = arith.constant 0 : i32
    %c0_i32_1 = arith.constant 0 : i32
    return %c0_i32, %c0_i32_0 : i32, i32
  }
  func.func @transform_9(%arg0: i32, %arg1: i32, %arg2: i32) -> (i32, i32) {
    %c0_i32 = arith.constant 0 : i32
    %c0_i32_0 = arith.constant 0 : i32
    %c0_i32_1 = arith.constant 0 : i32
    return %c0_i32, %c0_i32_0 : i32, i32
  }
  func.func @transform_10(%arg0: i32, %arg1: i32, %arg2: i32) -> (i32, i32) {
    %c0_i32 = arith.constant 0 : i32
    %c0_i32_0 = arith.constant 0 : i32
    %c0_i32_1 = arith.constant 0 : i32
    return %c0_i32, %c0_i32_0 : i32, i32
  }
  func.func @transform_11(%arg0: i32, %arg1: i32, %arg2: i32) -> (i32, i32) {
    %c0_i32 = arith.constant 0 : i32
    %c0_i32_0 = arith.constant 0 : i32
    %c0_i32_1 = arith.constant 0 : i32
    return %c0_i32, %c0_i32_0 : i32, i32
  }
  func.func @transform_12(%arg0: i32, %arg1: i32, %arg2: i32) -> (i32, i32) {
    %c0_i32 = arith.constant 0 : i32
    %c0_i32_0 = arith.constant 0 : i32
    %c0_i32_1 = arith.constant 0 : i32
    return %c0_i32, %c0_i32_0 : i32, i32
  }
  func.func @transform_13(%arg0: i32, %arg1: i32, %arg2: i32) -> (i32, i32, i32) {
    %c0_i32 = arith.constant 0 : i32
    %c0_i32_0 = arith.constant 0 : i32
    return %arg0, %arg1, %c0_i32 : i32, i32, i32
  }
}

</mosaic_0001>

<bundles_post_ra>
// kernel: tpu_custom_call.1
= control target key start
LH: loop header
LB: loop body
LE: loop exit
PB: predicated region body
PF: predicated region fallthrough
CT: control target
= control target key end

     0   :  { %s2642_s0 = inlined_call_operand.hbm [shape: f32[2,8,32], index: 0, kind: input, shape index: {}]   ;;  %s2643_s1 = inlined_call_operand.hbm [shape: f32[2,8,32], index: 1, kind: input, shape index: {}]   ;;  %s2644_s2 = inlined_call_operand.hbm [shape: f32[2,8,32], index: 2, kind: input, shape index: {}]   ;;  %s2645_s3 = inlined_call_operand.hbm [shape: f32[2,8,32], index: 3, kind: input, shape index: {}]   ;;  %s2646_s4 = inlined_call_operand.vmem [shape: f32[32,48], index: 4, kind: input, shape index: {}]   ;;  %s2647_s5 = inlined_call_operand.vmem [shape: f32[1,48], index: 5, kind: input, shape index: {}]   ;;  %s2648_s6 = inlined_call_operand.vmem [shape: f32[32,48], index: 6, kind: input, shape index: {}]   ;;  %s2649_s7 = inlined_call_operand.vmem [shape: f32[32,48], index: 7, kind: input, shape index: {}]   ;;  %s2650_s8 = inlined_call_operand.vmem [shape: f32[1,48], index: 8, kind: input, shape index: {}]   ;;  %s2651_s9 = inlined_call_operand.vmem [shape: f32[48,32], index: 9, kind: input, shape index: {}]   ;;  %s2652_s10 = inlined_call_operand.vmem [shape: f32[1,32], index: 10, kind: input, shape index: {}]   ;;  %s2653_s11 = inlined_call_operand.vmem [shape: f32[1,32], index: 11, kind: input, shape index: {}]   ;;  %s2654_s12 = inlined_call_operand.vmem [shape: f32[1,32], index: 12, kind: input, shape index: {}]   ;;  %s2655_s13 = inlined_call_operand.hbm [shape: f32[2,8,32], index: 13, kind: output, shape index: {}]  }
   0x1   :  { %2671 = sst [smem:[#allocation24_spill]] %s2643_s1 }
   0x2   :  { %2672 = sst [smem:[#allocation25_spill]] %s2651_s9 }
   0x3   :  { %2673 = sst [smem:[#allocation26_spill]] %s2652_s10 }
   0x4   :  { %2674 = sst [smem:[#allocation27_spill]] %s2653_s11 }
   0x5   :  { %2675 = sst [smem:[#allocation28_spill]] %s2654_s12 }
   0x6   :  { %2676 = sst [smem:[#allocation29_spill]] %s2655_s13 }
   0x7   :  { %18 = vsyncpa [#allocation3], 0 }
   0x8   :  { %20 = vsyncpa [#allocation3 + $0x1], 0 }
   0x9   :  { %21 = vsyncpa [#allocation6], 0 }
   0xa   :  { %23 = vsyncpa [#allocation6 + $0x1], 0 }
   0xb   :  { %24 = vsyncpa [#allocation9], 0 }
   0xc   :  { %26 = vsyncpa [#allocation9 + $0x1], 0 }
   0xd   :  { %27 = vsyncpa [#allocation4], 0 }
   0xe   :  { %29 = vsyncpa [#allocation4 + $0x1], 0  ;;  %s2206_s25 = smov 0   ;;  %s2208_s26 = smov 0  }
   0xf   :  { %s2210_s27 = smov 0   ;;  %s2212_s28 = smov 0  }
  0x10   :  { %s2214_s29 = smov 0   ;;  %s2216_s30 = smov 0  }
  0x11 LB: > { %2677 = sst [smem:[#allocation15_spill]] %s2102_s25  ;;  %s2237_s14 = sadd.s32 4294967295, %s2122_s30   ;;  %s2122_s30 = sphi %s2216_s30, %s35_s30   ;;  %s2118_s29 = sphi %s2214_s29, %s2716_s29   ;;  %s2114_s28 = sphi %s2212_s28, %s2715_s28   ;;  %s2110_s27 = sphi %s2210_s27, %s2714_s27   ;;  %s2106_s26 = sphi %s2208_s26, %s2718_s26   ;;  %s2102_s25 = sphi %s2206_s25, %s2717_s25  }
  0x12   : > { %2678 = sst [smem:[#allocation16_spill]] %s2110_s27  ;;  %s1636_s15 = sadd.s32 4294967294, %s2122_s30  }
  0x13   : > { %2679 = sst [smem:[#allocation17_spill]] %s2114_s28  ;;  %s54_s16 = sadd.s32 1, %s2118_s29 }
  0x14   : > { %2680 = sst [smem:[#allocation18_spill]] %s2118_s29  ;;  %s63_s17 = sadd.s32 1, %s2110_s27 }
  0x15   : > { %2681 = sst [smem:[#allocation19_spill]] %s2122_s30  ;;  %p56_p0 = scmp.ge.s32.totalorder %s54_s16, 2 }
  0x16   : > { %p70_p1 = scmp.ne.s32.totalorder %s2110_s27, %s2106_s26  ;;  %p71_p2 = scmp.eq.s32.totalorder %s2122_s30, 0 }
  0x17   : > { %p76_p3 = scmp.ne.s32.totalorder %s2106_s26, %s2102_s25  ;;  %s2720_s16 = smov (%p56_p0, %s54_s16), 0 }
  0x18   : > { %2682 = sst [smem:[#allocation20_spill]] %s2720_s16  ;;  %p2249_p4 = por %p71_p2, %p70_p1 }
  0x19   : > { %p77_p5 = scmp.eq.s32.totalorder %s2237_s14, 0  ;;  %s58_s19 = ssub.s32 %s2118_s29, %s2720_s16 }
  0x1a   : > { %p375_p6 = scmp.eq.s32.totalorder %s2237_s14, 1  ;;  %p61_p7 = scmp.eq.s32.totalorder %s58_s19, 0 }
  0x1b   : > { %p2257_p8 = por %p77_p5, %p76_p3  ;;  %p381_p10 = scmp.eq.s32.totalorder %s1636_s15, 1 }
  0x1c   : > { %p2261_p9 = por %p375_p6, %p70_p1  ;;  %p1841_p13 = scmp.lt.s32.totalorder %s2122_s30, 2 }
  0x1d   : > { %s2684_s20 = scalar_select %p2257_p8, 1, 0 }
  0x1e   : > { %s2685_s21 = scalar_select %p2261_p9, 1, 0 }
  0x1f   : > { %s2266_s22 = scalar_select %p61_p7, %s2110_s27, %s63_s17  }
  0x20   : > { %2686 = sst [smem:[#allocation21_spill]] %s2685_s21  ;;  %p2268_p11 = por %p381_p10, %p76_p3 }
  0x21   : > { %2687 = sst [smem:[#allocation22_spill]] %s2266_s22  ;;  %s2275_s24 = sand.u32 1, %s2110_s27  }
  0x22   : > { %s2688_s23 = scalar_select %p2268_p11, 1, 0 }
  0x23   : > { %s2278_s19 = sshll.u32 %s2275_s24, 3  ;;  %s2281_s16 = sshll.u32 %s2118_s29, 7 }
  0x24   : > { %2689 = sst [smem:[#allocation23_spill]] %s2688_s23  ;;  %p2285_p0 = pnand %p1841_p13, %p2249_p4 }
  0x25   : > { %s447_s17 = sand.u32 1, %s2122_s30   ;;  %s2691_s1 = sld [smem:[#allocation24_spill]] }
  0x26   : > { %s2690_s15 = scalar_select %p2285_p0, 1, 0 }
  0x27   : > { %s451_s27 = scalar_lea.vmem [#allocation5], %s2278_s19  ;;  %s2301_s18 = scalar_lea.sflag [#allocation6], %s447_s17 }
  0x28   : > { %s459_s29 = sshll.u32 %s451_s27, 4  ;;  %p2307_p4 = pneg %p2285_p0  ;;  %s2298_s29 = int_to_ptr.vmem [resolvable:$true] %s459_s29 }
  0x2b   : > { %s2294_s25 = scalar_lea.hbm %s2691_s1, %s2281_s16  ;;  %s1917_s27 = scalar_lea.hbm %s2691_s1, 256 }
  0x2c   : > { %s1912_s13 = scalar_lea.hbm %s2294_s25, 128  ;;  %p1918_p7 = scmp.lt.u32.totalorder %s2294_s25, %s2691_s1 }
  0x2d   : > { %p1913_p3 = scmp.ne.s32.totalorder %s2294_s25, %s1912_s13  ;;  %p1919_p10 = scmp.lt.u32.totalorder %s1917_s27, %s1912_s13 }
  0x2e   : > { %p1921_p12 = scmp.lt.u32.totalorder %s1912_s13, %s2294_s25 }
  0x2f   : > { %p1915_p5 = pnand %p2307_p4, %p1913_p3  ;;  %p1920_p13 = por %p1919_p10, %p1918_p7 }
  0x31   : > { %p1916_p6 = pneg %p1915_p5  ;;  %p1922_p1 = por %p1921_p12, %p1920_p13 }
  0x33   : > { %p1923_p2 = pnand %p1922_p1, %p1916_p6 }
  0x35   : > { %1926 = shalt.err (!%p1923_p2)
}
  0x36   : > { %s1927_s17 = scalar_lea.vmem %s2298_s29, 128  ;;  %s2124_s22 = smov [#allocation5]  }
  0x37   : > { %p1928_p3 = scmp.ne.s32.totalorder %s2298_s29, %s1927_s17  ;;  %s1932_s23 = sshll.u32 %s2124_s22, 4  ;;  %s1933_s23 = int_to_ptr.vmem [resolvable:$false] %s1932_s23 }
  0x38   : > { %s1934_s11 = scalar_lea.vmem %s1933_s23, 256  ;;  %p1935_p9 = scmp.lt.s32.totalorder %s2298_s29, %s1933_s23 }
  0x39   : > { %p1930_p5 = pnand %p1928_p3, %p2307_p4  ;;  %p1936_p8 = scmp.lt.s32.totalorder %s1934_s11, %s1927_s17 }
  0x3b   : > { %p1931_p11 = pneg %p1930_p5  ;;  %p1937_p7 = por %p1936_p8, %p1935_p9 }
  0x3d   : > { %p1938_p10 = pnand %p1937_p7, %p1931_p11 }
  0x3f   : > { %1941 = shalt.err (!%p1938_p10)
}
  0x40   : > { %1830 = dma.hbm_to_vmem [thread:$0]  (!%p2285_p0), %s2294_s25, 128, %s2298_s29, %s2301_s18  }
  0x41   : > { %p2693_p12 = scmp.lt.s32.totalorder %s2122_s30, 3  ;;  %p2694_p1 = scmp.ge.s32.totalorder %s2122_s30, 1 }
  0x42   : > { %s2343_s17 = scalar_lea.hbm %s2642_s0, %s2281_s16  ;;  %s432_s22 = scalar_lea.vmem [#allocation2], %s2278_s19 }
  0x43   : > { %p2335_p2 = pnand %p2694_p1, %p2693_p12  ;;  %s440_s23 = sshll.u32 %s432_s22, 4  ;;  %s2346_s23 = int_to_ptr.vmem [resolvable:$true] %s440_s23 }
  0x44   : > { %s2352_s11 = scalar_lea.hbm %s2644_s2, %s2281_s16  ;;  %s429_s1 = scalar_lea.sflag [#allocation3], %s2275_s24 }
  0x45   : > { %s2695_s13 = scalar_select %p2335_p2, 1, 0 }
  0x46   : > { %s1942_s30 = scalar_lea.hbm %s2343_s17, 128  ;;  %s1947_s28 = scalar_lea.hbm %s2642_s0, 256 }
  0x47   : > { %p1943_p8 = scmp.ne.s32.totalorder %s2343_s17, %s1942_s30  ;;  %p1948_p6 = scmp.lt.u32.totalorder %s2343_s17, %s2642_s0 }
  0x48   : > { %p1949_p13 = scmp.lt.u32.totalorder %s1947_s28, %s1942_s30  ;;  %p1951_p5 = scmp.lt.u32.totalorder %s1942_s30, %s2343_s17 }
  0x49   : > { %p1945_p9 = pnand %p1943_p8, %p2307_p4 }
  0x4a   : > { %p1950_p3 = por %p1949_p13, %p1948_p6 }
  0x4b   : > { %p1946_p11 = pneg %p1945_p9 }
  0x4c   : > { %p1952_p7 = por %p1951_p5, %p1950_p3 }
  0x4e   : > { %p1953_p10 = pnand %p1952_p7, %p1946_p11 }
  0x50   : > { %1956 = shalt.err (!%p1953_p10)
}
  0x51   : > { %s1957_s22 = scalar_lea.vmem %s2346_s23, 128  ;;  %s2125_s25 = smov [#allocation2]  }
  0x52   : > { %p1958_p12 = scmp.ne.s32.totalorder %s2346_s23, %s1957_s22  ;;  %s1962_s29 = sshll.u32 %s2125_s25, 4  ;;  %s1963_s29 = int_to_ptr.vmem [resolvable:$false] %s1962_s29 }
  0x53   : > { %s1964_s9 = scalar_lea.vmem %s1963_s29, 256  ;;  %p1965_p9 = scmp.lt.s32.totalorder %s2346_s23, %s1963_s29 }
  0x54   : > { %p1960_p1 = pnand %p1958_p12, %p2307_p4  ;;  %p1966_p2 = scmp.lt.s32.totalorder %s1964_s9, %s1957_s22 }
  0x56   : > { %p1961_p8 = pneg %p1960_p1  ;;  %p1967_p6 = por %p1966_p2, %p1965_p9 }
  0x58   : > { %p1968_p13 = pnand %p1967_p6, %p1961_p8 }
  0x5a   : > { %1971 = shalt.err (!%p1968_p13)
}
  0x5b   : > { %1827 = dma.hbm_to_vmem [thread:$0]  (!%p2285_p0), %s2343_s17, 128, %s2346_s23, %s429_s1  }
  0x5c   : > { %s470_s10 = scalar_lea.vmem [#allocation7], %s2278_s19  ;;  %s1972_s30 = scalar_lea.hbm %s2352_s11, 128 }
  0x5d   : > { %s478_s28 = sshll.u32 %s470_s10, 4  ;;  %p1973_p11 = scmp.ne.s32.totalorder %s2352_s11, %s1972_s30  ;;  %s479_s28 = int_to_ptr.vmem [resolvable:$true] %s478_s28 }
  0x5e   : > { %s1977_s22 = scalar_lea.hbm %s2644_s2, 256  ;;  %p1978_p5 = scmp.lt.u32.totalorder %s2352_s11, %s2644_s2 }
  0x5f   : > { %p1975_p2 = pnand %p1973_p11, %p2307_p4  ;;  %p1979_p7 = scmp.lt.u32.totalorder %s1977_s22, %s1972_s30 }
  0x60   : > { %p1981_p12 = scmp.lt.u32.totalorder %s1972_s30, %s2352_s11 }
  0x61   : > { %p1976_p3 = pneg %p1975_p2  ;;  %p1980_p10 = por %p1979_p7, %p1978_p5 }
  0x63   : > { %p1982_p1 = por %p1981_p12, %p1980_p10 }
  0x65   : > { %p1983_p8 = pnand %p1982_p1, %p1976_p3 }
  0x67   : > { %1986 = shalt.err (!%p1983_p8)
}
  0x68   : > { %s1987_s1 = scalar_lea.vmem %s479_s28, 128  ;;  %s2126_s17 = smov [#allocation7]  }
  0x69   : > { %p1988_p9 = scmp.ne.s32.totalorder %s479_s28, %s1987_s1  ;;  %s1992_s23 = sshll.u32 %s2126_s17, 4  ;;  %s1993_s23 = int_to_ptr.vmem [resolvable:$false] %s1992_s23 }
  0x6a   : > { %s1994_s9 = scalar_lea.vmem %s1993_s23, 256  ;;  %p1995_p11 = scmp.lt.s32.totalorder %s479_s28, %s1993_s23 }
  0x6b   : > { %p1990_p6 = pnand %p1988_p9, %p2307_p4  ;;  %p1996_p2 = scmp.lt.s32.totalorder %s1994_s9, %s1987_s1 }
  0x6d   : > { %p1991_p13 = pneg %p1990_p6  ;;  %p1997_p0 = por %p1996_p2, %p1995_p11 }
  0x6f   : > { %p1998_p5 = pnand %p1997_p0, %p1991_p13 }
  0x71   : > { %2001 = shalt.err (!%p1998_p5)
}
  0x72   : > { %p2696_p7 = scmp.ne.s32.totalorder %s2690_s15, 0  ;;  %s2399_s21 = scalar_lea.hbm %s2645_s3, %s2281_s16 }
  0x73   : > { %s489_s27 = scalar_lea.vmem [#allocation8], %s2278_s19  ;;  %s486_s25 = scalar_lea.sflag [#allocation9], %s2275_s24 }
  0x74   : > { %1833 = dma.hbm_to_vmem [thread:$0]  (!%p2696_p7), %s2352_s11, 128, %s479_s28, %s2301_s18  }
  0x75   : > { %s497_s22 = sshll.u32 %s489_s27, 4  ;;  %s2002_s29 = scalar_lea.hbm %s2399_s21, 128  ;;  %s498_s22 = int_to_ptr.vmem [resolvable:$true] %s497_s22 }
  0x76   : > { %p2003_p0 = scmp.ne.s32.totalorder %s2399_s21, %s2002_s29  ;;  %s2007_s11 = scalar_lea.hbm %s2645_s3, 256 }
  0x77   : > { %p2008_p12 = scmp.lt.u32.totalorder %s2399_s21, %s2645_s3  ;;  %p2009_p1 = scmp.lt.u32.totalorder %s2007_s11, %s2002_s29 }
  0x78   : > { %p2005_p3 = pnand %p2003_p0, %p2307_p4  ;;  %p2011_p9 = scmp.lt.u32.totalorder %s2002_s29, %s2399_s21 }
  0x79   : > { %p2010_p8 = por %p2009_p1, %p2008_p12 }
  0x7a   : > { %p2006_p10 = pneg %p2005_p3 }
  0x7b   : > { %p2012_p6 = por %p2011_p9, %p2010_p8 }
  0x7d   : > { %p2013_p13 = pnand %p2012_p6, %p2006_p10 }
  0x7f   : > { %2016 = shalt.err (!%p2013_p13)
}
  0x80   : > { %s2017_s24 = scalar_lea.vmem %s498_s22, 128  ;;  %s2127_s19 = smov [#allocation8]  }
  0x81   : > { %p2018_p11 = scmp.ne.s32.totalorder %s498_s22, %s2017_s24  ;;  %s2022_s17 = sshll.u32 %s2127_s19, 4  ;;  %s2023_s17 = int_to_ptr.vmem [resolvable:$false] %s2022_s17 }
  0x82   : > { %s2024_s23 = scalar_lea.vmem %s2023_s17, 256  ;;  %p2025_p0 = scmp.lt.s32.totalorder %s498_s22, %s2023_s17 }
  0x83   : > { %p2020_p2 = pnand %p2018_p11, %p2307_p4  ;;  %p2026_p3 = scmp.lt.s32.totalorder %s2024_s23, %s2017_s24 }
  0x85   : > { %p2021_p5 = pneg %p2020_p2  ;;  %p2027_p7 = por %p2026_p3, %p2025_p0 }
  0x87   : > { %p2028_p1 = pnand %p2027_p7, %p2021_p5 }
  0x89   : > { %2031 = shalt.err (!%p2028_p1)
}
  0x8a   : > { %p2697_p12 = scmp.ne.s32.totalorder %s2690_s15, 0  ;;  %p2698_p10 = scmp.ne.s32.totalorder %s2695_s13, 0 }
  0x8b   : > { %s2423_s12 = sand.u32 (!%p2698_p10), 1, %s2106_s26   ;;  %p2699_p4 = scmp.ne.s32.totalorder (!%p2698_p10), %s2684_s20, 0 }
  0x8c   : > { %1836 = dma.hbm_to_vmem [thread:$0]  (!%p2697_p12), %s2399_s21, 128, %s498_s22, %s486_s25  }
  0x8d   : > { %506 = sbr.rel (%p2698_p10) target bundleno = 1906 (0x772), region = 72  ;;  %s2426_s9 = sshll.u32 (!%p2698_p10), %s2423_s12, 3 }
  0x8e   : > { %s509_s10 = scalar_lea.sflag (!%p2698_p10), [#allocation3], %s2423_s12  ;;  %s512_s30 = scalar_lea.vmem (!%p2698_p10), [#allocation2], %s2426_s9 }
  0x94   : > { %2085 = dma.done.wait (%p2699_p4), %s509_s10, 128  }
  0x95   : > { %2087 = vsyncadd (%p2699_p4), %s509_s10, 4294967168  ;;  %s517_s15 = sand.u32 1, %s2237_s14   ;;  %s521_s21 = scalar_lea.vmem [#allocation5], %s2426_s9 }
  0x96   : > { %s518_s13 = scalar_lea.sflag [#allocation6], %s517_s15 }
  0x97   : > { %2089 = dma.done.wait (%p2699_p4), %s518_s13, 256  }
  0x98   : > { %2091 = vsyncadd (%p2699_p4), %s518_s13, 4294967040  ;;  %s530_s27 = scalar_lea.vmem [#allocation7], %s2426_s9  ;;  %s536_s22 = scalar_lea.sflag [#allocation9], %s2423_s12 }
  0x99   : > { %s539_s25 = scalar_lea.vmem [#allocation8], %s2426_s9 }
  0x9a   : > { %2093 = dma.done.wait (%p2699_p4), %s536_s22, 128  }
  0x9b   : > { %2095 = vsyncadd (%p2699_p4), %s536_s22, 4294967168  ;;  %v2128_v0 = vmov 0.0|0.0   ;;  %vm2129_vm0 = vmmov 0   ;;  %v2130_v1 = vmov 0.0   ;;  %v600_v2 = vld [vmem:[%s2646_s4] sm:$0xff]  ;;  %v601_v3 = vld [vmem:[%s2646_s4 + $0x8] sm:$0xff] }
  0x9c   : > { %1787 = vmatprep.subr.bf16.mxu1 %v2128_v0  ;;  %1717 = vmatprep.mubr.msk.f32.mxu1 %vm2129_vm0, %v2130_v1  ;;  %v602_v4 = vld [vmem:[%s2646_s4 + $0x10] sm:$0xff]  ;;  %v1788_v5 = vpack.c.bf16 %v601_v3, %v600_v2  ;;  %v603_v6 = vld [vmem:[%s2646_s4 + $0x18] sm:$0xff]  ;;  %v2465_v8 = vld [vmem:[%s512_s30] sm:$0xff]  ;;  %vm611_vm1 = vcmask 261120   ;;  %vm849_vm2 = vcmask 130048   ;;  %s2131_s28 = smov 96  }
  0x9d   : > { %1799 = vmatprep.subr.bf16.mxu0 %v2128_v0  ;;  %1739 = vmatprep.mubr.msk.f32.mxu0 %vm2129_vm0, %v2130_v1  ;;  %v1791_v7 = vpack.c.bf16 %v603_v6, %v602_v4  ;;  %v598_v9 = vld [vmem:[%s521_s21] sm:$0xff]  ;;  %v688_v10 = vld [vmem:[%s2648_s6] sm:$0xff]  ;;  %v689_v11 = vld [vmem:[%s2648_s6 + $0x8] sm:$0xff]  ;;  %s2132_s16 = smov 112   ;;  %vm926_vm3 = vcmask 64512   ;;  %s2700_s10 = sld [smem:[#allocation25_spill]] }
  0x9e   : > { %1789 = vmatpush3.bf16.msra.mxu1 %v1788_v5  ;;  %v599_v12 = vadd.f32 %v598_v9, %v2465_v8  ;;  %v1794_v13 = vpack.c.bf16 %v689_v11, %v688_v10  ;;  %v690_v14 = vld [vmem:[%s2648_s6 + $0x10] sm:$0xff]  ;;  %v691_v15 = vld [vmem:[%s2648_s6 + $0x18] sm:$0xff]  ;;  %v685_v17 = vld [vmem:[%s530_s27] sm:$0xff]  ;;  %s2133_s20 = smov 16   ;;  %s2134_s18 = smov 32   ;;  %vm1365_vm4 = vcmask 392192  }
  0x9f   : > { %1790 = vmatprep.subr.bf16.mxu1 %v2128_v0  ;;  %v1797_v16 = vpack.c.bf16 %v691_v15, %v690_v14  ;;  %v686_v18 = vld [vmem:[%s539_s25] sm:$0xff]  ;;  %v765_v20 = vld [vmem:[%s2649_s7] sm:$0xff]  ;;  %v766_v21 = vld [vmem:[%s2649_s7 + $0x8] sm:$0xff]  ;;  %s2702_s24 = sld [smem:[#allocation17_spill]]  ;;  %s2703_s19 = sld [smem:[#allocation21_spill]] }
  0xa0   : > { %v687_v19 = vadd.f32 %v686_v18, %v685_v17  ;;  %v767_v22 = vld [vmem:[%s2649_s7 + $0x10] sm:$0xff]  ;;  %v1800_v23 = vpack.c.bf16 %v766_v21, %v765_v20  ;;  %v768_v24 = vld [vmem:[%s2649_s7 + $0x18] sm:$0xff]  ;;  %v1653_v28 = vld [vmem:[%s2647_s5] ss:$0 sm:$0xff]  ;;  %s2704_s30 = sld [smem:[#allocation27_spill]]  ;;  %s2705_s21 = sld [smem:[#allocation28_spill]] }
  0xa1   : > { %v1803_v25 = vpack.c.bf16 %v768_v24, %v767_v22  ;;  %v1656_v32 = vld [vmem:[%s2650_s8] ss:$0 sm:$0xff]  ;;  %s596_s14 = scalar_lea.vmem [#allocation10], %s2426_s9  ;;  %s2706_s1 = sld [smem:[#allocation29_spill]] }
  0xa2   : > { %1792 = vmatpush3.bf16.msra.mxu1 %v1791_v7  ;;  %1801 = vmatpush3.bf16.msra.mxu0 %v1800_v23  ;;  %s1486_s29 = sshll.u32 %s596_s14, 4  ;;  %s2135_s9 = smov [#allocation10]   ;;  %s2594_s29 = int_to_ptr.vmem [resolvable:$true] %s1486_s29 }
  0xa3   : > { %1793 = vmatprep.subr.bf16.mxu1 %v2128_v0  ;;  %1802 = vmatprep.subr.bf16.mxu0 %v2128_v0  ;;  %v1352_v14 = vld [vmem:[%s2700_s10] sm:$0xff]  ;;  %v1353_v15 = vld [vmem:[%s2700_s10 + $0x8] sm:$0xff]  ;;  %s2032_s11 = scalar_lea.vmem %s2594_s29, 128 }
  0xa4   : > { %v1356_v21 = vld [vmem:[%s2700_s10 + $0x20] sm:$0xff]  ;;  %v1357_v22 = vld [vmem:[%s2700_s10 + $0x28] sm:$0xff]  ;;  %p2033_p7 = scmp.ne.s32.totalorder %s2594_s29, %s2032_s11 }
  0xa5   : > { %1718 = vmatmul.mubr.msk.f32.vlgmr.msra.gmra.mrb[0].mxu1 %vm611_vm1, %v599_v12  ;;  %v1812_v23 = vpack.c.bf16 %v1357_v22, %v1356_v21  ;;  %s1672_s22 = sshll.u32 %s2702_s24, 7  ;;  %p2707_p8 = scmp.ne.s32.totalorder %s2703_s19, 0 }
  0xa6   : > { %1795 = vmatpush3.bf16.msra.mxu1 %v1794_v13  ;;  %1728 = vmatprep.mubr.msk.f32.mxu1 %vm2129_vm0, %v2130_v1 }
  0xa7   : > { %1796 = vmatprep.subr.bf16.mxu1 %v2128_v0  ;;  %1804 = vmatpush3.bf16.msra.mxu0 %v1803_v25  ;;  %p2034_p9 = pnand %p2033_p7, %p2707_p8 }
  0xa8   : > { %1752 = vmatprep.subr.mxu0 %v2130_v1 }
  0xa9   : > { %p2035_p6 = pneg %p2034_p9 }
  0xaa   : > { %1798 = vmatpush3.bf16.msra.mxu1 %v1797_v16  ;;  %1740 = vmatmul.mubr.msk.f32.vlgmr.msra.gmra.mrb[0].mxu0 %vm611_vm1, %v685_v17  ;;  %v1354_v16 = vld [vmem:[%s2700_s10 + $0x10] sm:$0xff]  ;;  %v1806_v17 = vpack.c.bf16 %v1353_v15, %v1352_v14 }
  0xab   : > { %1742 = vmatprep.subr.mxu1 %v2130_v1  ;;  %1754 = vmatprep.mubr.msk.f32.mxu0 %vm2129_vm0, %v2130_v1 }
  0xad   : > { %1729 = vmatmul.mubr.msk.f32.vlgmr.msra.gmra.mrb[2].mxu1 %vm611_vm1, %v687_v19 }
  0xae   : > { %1744 = vmatprep.mubr.msk.f32.mxu1 %vm2129_vm0, %v2130_v1 }
 0x178   : > { %v681_v26 = vpop.f32.mrb[0].mxu1 }
 0x179   : > { %v1719_v27 = vpop.f32.mrb[1].mxu1  ;;  %v682_v31 = vadd.f32 %v1653_v28, %v681_v26 }
 0x17d   : > { %v845_v33 = vpop.f32.mrb[0].mxu0 }
 0x17e   : > { %v846_v34 = vadd.f32 %v1656_v32, %v845_v33  ;;  %v1741_v35 = vpop.f32.mrb[1].mxu0 }
 0x180   : > { %v761_v29 = vpop.f32.mrb[2].mxu1 }
 0x181   : > { %1179 = vrot.lane.b32.xlu1 %v761_v29, %s2131_s28  ;;  %1013 = vrot.lane.b32.xlu0 %v761_v29, %s2132_s16  ;;  %v1730_v30 = vpop.f32.mrb[3].mxu1 }
 0x182   : > { %1743 = vmatpush3.xpose.msk.msra.mxu1 %vm849_vm2, %v761_v29 }
 0x183   : > { %1747 = vmatprep.subr.mxu1 %v2130_v1 }
 0x185   : > { %1745 = vmatmul.mubr.msk.f32.vlgmr.msra.gmra.mrb[4].mxu1 %vm849_vm2, %v682_v31  ;;  %1177 = vrot.lane.b32.xlu1 %v682_v31, %s2131_s28 }
 0x186   : > { %1011 = vrot.lane.b32.xlu0 %v682_v31, %s2132_s16  ;;  %1749 = vmatprep.mubr.msk.f32.mxu1 %vm2129_vm0, %v2130_v1 }
 0x187   : > { %1748 = vmatpush3.msra.mxu1 %v846_v34 }
 0x188   : > { %1757 = vmatprep.subr.mxu1 %v2130_v1 }
 0x1f3   : > { %v1014_v36 = vpop.permute.xlu0 %1013  ;;  %v1180_v37 = vpop.permute.xlu1 %1179 }
 0x1f4   : > { %1753 = vmatpush3.xpose.msk.msra.mxu0 %vm849_vm2, %v1014_v36 }
 0x1f5   : > { %1762 = vmatprep.subr.mxu0 %v2130_v1 }
 0x1f7   : > { %v1178_v39 = vpop.permute.xlu1 %1177 }
 0x1f8   : > { %v1012_v38 = vpop.permute.xlu0 %1011 }
 0x1f9   : > { %1755 = vmatmul.mubr.msk.f32.vlgmr.msra.gmra.mrb[2].mxu0 %vm849_vm2, %v1012_v38 }
 0x1fa   : > { %1763 = vmatpush3.xpose.msk.msra.mxu0 %vm849_vm2, %v1180_v37  ;;  %1764 = vmatprep.mubr.msk.f32.mxu0 %vm2129_vm0, %v2130_v1 }
 0x1fb   : > { %1805 = vmatprep.subr.bf16.mxu0 %v2128_v0 }
 0x1fd   : > { %1765 = vmatmul.mubr.msk.f32.vlgmr.msra.gmra.mrb[4].mxu0 %vm849_vm2, %v1178_v39 }
 0x1fe   : > { %1784 = vmatprep.mubr.msk.f32.mxu0 %vm2129_vm0, %v2130_v1  ;;  %1807 = vmatpush3.bf16.msra.mxu0 %v1806_v17 }
 0x1ff   : > { %1808 = vmatprep.subr.bf16.mxu0 %v2128_v0 }
 0x258   : > { %v922_v40 = vpop.f32.mrb[4].mxu1 }
 0x259   : > { %v1746_v41 = vpop.f32.mrb[5].mxu1  ;;  %v927_v42 = vsel %vm926_vm3, %v922_v40, -inf }
 0x25a   : > { %928 = vmax.xlane.f32.xlu0 %v927_v42 }
 0x2cc   : > { %v1085_v43 = vpop.f32.mrb[2].mxu0 }
 0x2cd   : > { %v1756_v44 = vpop.f32.mrb[3].mxu0  ;;  %v1089_v45 = vsel %vm926_vm3, %v1085_v43, -inf }
 0x2ce   : > { %1090 = vmax.xlane.f32.xlu1 %v1089_v45 }
 0x2d0   : > { %v1251_v46 = vpop.f32.mrb[4].mxu0 }
 0x2d1   : > { %v1766_v47 = vpop.f32.mrb[5].mxu0  ;;  %v1255_v48 = vsel %vm926_vm3, %v1251_v46, -inf }
 0x2d2   : > { %1256 = vmax.xlane.f32.xlu0 %v1255_v48  ;;  %v1670_v47 = vld [vmem:[%s2705_s21] ss:$0 sm:$0xff] }
 0x2e7   : > { %v929_v49 = vpop.xlane.xlu0 %928 }
 0x2e8   : > { %v930_v50 = vsub.f32 %v922_v40, %v929_v49 }
 0x2ea   : > { %v931_v51 = vmul.f32 1.442695, %v930_v50 }
 0x2ec   : > { %1898 = vpow2.f32 %v931_v51 }
 0x2f6   : > { %v1899_v52 = vpop.eup %1898 }
 0x2f7   : > { %v933_v53 = vsel %vm926_vm3, %v1899_v52, 0.0 }
 0x2f8   : > { %934 = vadd.xlane.f32.xlu0 %v933_v53 }
 0x35b   : > { %v1091_v54 = vpop.xlane.xlu1 %1090 }
 0x35c   : > { %v1092_v55 = vsub.f32 %v1085_v43, %v1091_v54 }
 0x35e   : > { %v1093_v56 = vmul.f32 1.442695, %v1092_v55 }
 0x35f   : > { %v1257_v57 = vpop.xlane.xlu0 %1256 }
 0x360   : > { %1900 = vpow2.f32 %v1093_v56  ;;  %v1258_v58 = vsub.f32 %v1251_v46, %v1257_v57 }
 0x362   : > { %v1259_v59 = vmul.f32 1.442695, %v1258_v58 }
 0x364   : > { %1902 = vpow2.f32 %v1259_v59 }
 0x36a   : > { %v1901_v60 = vpop.eup %1900 }
 0x36b   : > { %v1095_v61 = vsel %vm926_vm3, %v1901_v60, 0.0 }
 0x36c   : > { %1096 = vadd.xlane.f32.xlu1 %v1095_v61 }
 0x36e   : > { %v1903_v62 = vpop.eup %1902 }
 0x36f   : > { %v1261_v63 = vsel %vm926_vm3, %v1903_v62, 0.0 }
 0x370   : > { %1262 = vadd.xlane.f32.xlu0 %v1261_v63 }
 0x37d   : > { %1101 = vrot.lane.b32.xlu1 %v846_v34, %s2132_s16  ;;  %s2701_s16 = sld [smem:[#allocation26_spill]] }
 0x383   : > { %v1667_v31 = vld [vmem:[%s2701_s16] ss:$0 sm:$0xff] }
 0x385   : > { %v935_v2 = vpop.xlane.xlu0 %934 }
 0x386   : > { %1904 = vrcp.f32 %v935_v2  ;;  %1266 = vrot.lane.b32.xlu0 %v846_v34, %s2131_s28  ;;  %s2036_s28 = sshll.u32 %s2135_s9, 4  ;;  %s2037_s28 = int_to_ptr.vmem [resolvable:$false] %s2036_s28 }
 0x387   : > { %s2038_s16 = scalar_lea.vmem %s2037_s28, 256  ;;  %p2039_p13 = scmp.lt.s32.totalorder %s2594_s29, %s2037_s28 }
 0x388   : > { %p2040_p11 = scmp.lt.s32.totalorder %s2038_s16, %s2032_s11 }
 0x38a   : > { %p2041_p2 = por %p2040_p11, %p2039_p13 }
 0x38c   : > { %p2042_p5 = pnand %p2041_p2, %p2035_p6 }
 0x390   : > { %v1905_v3 = vpop.eup %1904 }
 0x391   : > { %v937_v4 = vmul.f32 %v1905_v3, %v1899_v52 }
 0x393   : > { %1750 = vmatmul.mubr.msk.f32.vlgmr.msra.gmra.mrb[6].mxu1 %vm926_vm3, %v937_v4 }
 0x394   : > { %1759 = vmatprep.mubr.msk.f32.mxu1 %vm2129_vm0, %v2130_v1 }
 0x3f9   : > { %v1097_v5 = vpop.xlane.xlu1 %1096 }
 0x3fa   : > { %1906 = vrcp.f32 %v1097_v5 }
 0x3fd   : > { %v1102_v6 = vpop.permute.xlu1 %1101  ;;  %v1263_v7 = vpop.xlane.xlu0 %1262 }
 0x3fe   : > { %1908 = vrcp.f32 %v1263_v7  ;;  %1758 = vmatpush3.msra.mxu1 %v1102_v6 }
 0x3ff   : > { %1767 = vmatprep.subr.mxu1 %v2130_v1 }
 0x401   : > { %v1267_v11 = vpop.permute.xlu0 %1266 }
 0x404   : > { %v1907_v9 = vpop.eup %1906 }
 0x405   : > { %v1099_v10 = vmul.f32 %v1907_v9, %v1901_v60 }
 0x407   : > { %1760 = vmatmul.mubr.msk.f32.vlgmr.msra.gmra.mrb[8].mxu1 %vm926_vm3, %v1099_v10 }
 0x408   : > { %v1909_v12 = vpop.eup %1908  ;;  %1768 = vmatpush3.msra.mxu1 %v1267_v11  ;;  %1769 = vmatprep.mubr.msk.f32.mxu1 %vm2129_vm0, %v2130_v1  ;;  %v1355_v1 = vld [vmem:[%s2700_s10 + $0x18] sm:$0xff] }
 0x409   : > { %v1265_v13 = vmul.f32 %v1909_v12, %v1903_v62  ;;  %v1809_v18 = vpack.c.bf16 %v1355_v1, %v1354_v16 }
 0x40b   : > { %1770 = vmatmul.mubr.msk.f32.vlgmr.msra.gmra.mrb[10].mxu1 %vm926_vm3, %v1265_v13  ;;  %1810 = vmatpush3.bf16.msra.mxu0 %v1809_v18 }
 0x40c   : > { %1811 = vmatprep.subr.bf16.mxu0 %v2128_v0 }
 0x40f   : > { %1813 = vmatpush3.bf16.msra.mxu0 %v1812_v23 }
 0x466   : > { %v1007_v19 = vpop.f32.mrb[6].mxu1 }
 0x467   : > { %v1751_v20 = vpop.f32.mrb[7].mxu1 }
 0x4da   : > { %v1173_v24 = vpop.f32.mrb[8].mxu1 }
 0x4db   : > { %1343 = vrot.lane.b32.xlu1 %v1173_v24, %s2133_s20  ;;  %v1761_v25 = vpop.f32.mrb[9].mxu1  ;;  %s2592_s20 = scalar_lea.hbm %s2706_s1, %s1672_s22 }
 0x4de   : > { %v1338_v26 = vpop.f32.mrb[10].mxu1 }
 0x4df   : > { %1347 = vrot.lane.b32.xlu1 %v1338_v26, %s2134_s18  ;;  %v1771_v27 = vpop.f32.mrb[11].mxu1  ;;  %s1472_s18 = scalar_lea.sflag [#allocation4], %s2423_s12 }
 0x54d   : > { %v1344_v28 = vpop.permute.xlu1 %1343 }
 0x54e   : > { %v1350_v0 = vsel %vm849_vm2, %v1007_v19, %v1344_v28 }
 0x551   : > { %v1348_v29 = vpop.permute.xlu1 %1347 }
 0x552   : > { %v1351_v30 = vsel %vm611_vm1, %v1350_v0, %v1348_v29 }
 0x553   : > { %1785 = vmatmul.mubr.msk.f32.vlgmr.msra.gmra.mrb[6].mxu0 %vm1365_vm4, %v1351_v30 }
 0x626   : > { %v1435_v32 = vpop.f32.mrb[6].mxu0 }
 0x627   : > { %v1436_v33 = vadd.f32 %v1667_v31, %v1435_v32  ;;  %v1786_v34 = vpop.f32.mrb[7].mxu0 }
 0x629   : > { %v1439_v35 = vadd.f32 %v1436_v33, %v2465_v8  ;;  %v1669_v8 = vld [vmem:[%s2704_s30] ss:$0 sm:$0xff] }
 0x62b   : > { %v1442_v36 = vsel %vm611_vm1, %v1439_v35, 0.0 }
 0x62c   : > { %1443 = vadd.xlane.f32.xlu0 %v1442_v36 }
 0x6b9   : > { %v1444_v37 = vpop.xlane.xlu0 %1443 }
 0x6ba   : > { %v1446_v38 = vmul.f32 0.03125, %v1444_v37 }
 0x6bc   : > { %v1447_v39 = vsub.f32 %v1439_v35, %v1446_v38 }
 0x6be   : > { %v1448_v40 = vmul.f32 %v1447_v39, %v1447_v39 }
 0x6c0   : > { %v1449_v41 = vsel %vm611_vm1, %v1448_v40, 0.0 }
 0x6c1   : > { %1450 = vadd.xlane.f32.xlu1 %v1449_v41 }
 0x74e   : > { %v1451_v42 = vpop.xlane.xlu1 %1450 }
 0x74f   : > { %v1452_v43 = vmul.f32 0.03125, %v1451_v42 }
 0x751   : > { %v1453_v44 = vadd.f32 1e-05, %v1452_v43 }
 0x753   : > { %1910 = vrsqrt.f32 %v1453_v44 }
 0x75d   : > { %v1911_v45 = vpop.eup %1910 }
 0x75e   : > { %v1455_v46 = vmul.f32 %v1911_v45, %v1447_v39 }
 0x760   : > { %v1462_v48 = vmul.f32 %v1669_v8, %v1455_v46 }
 0x762   : > { %v1469_v49 = vadd.f32 %v1670_v47, %v1462_v48 }
 0x764   : > { %1470 = vst.msk [vmem:[%s596_s14] sm:$0xff] %vm611_vm1, %v1469_v49 }
 0x765   : > { %2045 = shalt.err (!%p2042_p5)
}
 0x766   : > { %s2046_s12 = scalar_lea.hbm %s2592_s20, 128  ;;  %s2050_s23 = scalar_lea.hbm %s2706_s1, 256 }
 0x767   : > { %p2047_p0 = scmp.ne.s32.totalorder %s2592_s20, %s2046_s12  ;;  %p2051_p12 = scmp.lt.u32.totalorder %s2592_s20, %s2706_s1 }
 0x768   : > { %p2052_p10 = scmp.lt.u32.totalorder %s2050_s23, %s2046_s12  ;;  %p2054_p7 = scmp.lt.u32.totalorder %s2046_s12, %s2592_s20 }
 0x769   : > { %p2048_p3 = pnand %p2047_p0, %p2707_p8 }
 0x76a   : > { %p2053_p4 = por %p2052_p10, %p2051_p12 }
 0x76b   : > { %p2049_p1 = pneg %p2048_p3 }
 0x76c   : > { %p2055_p9 = por %p2054_p7, %p2053_p4 }
 0x76e   : > { %p2056_p6 = pnand %p2055_p9, %p2049_p1 }
 0x770   : > { %2059 = shalt.err (!%p2056_p6)
}
 0x771   : > { %1822 = dma.vmem_to_hbm [thread:$0]  (%p2707_p8), %s2594_s29, 128, %s2592_s20, %s1472_s18  }
 0x772 PF: > { %s2708_s13 = sld [smem:[#allocation15_spill]]  ;;  %s2709_s21 = sld [smem:[#allocation23_spill]] }
 0x773   : > { %s2710_s22 = sld [smem:[#allocation19_spill]] }
 0x778   : > { %s1498_s14 = sand.u32 1, %s2708_s13   ;;  %p2711_p13 = scmp.ne.s32.totalorder %s2709_s21, 0 }
 0x779   : > { %p2712_p11 = scmp.ge.s32.totalorder %s2710_s22, 2  ;;  %s1499_s27 = scalar_lea.sflag [#allocation4], %s1498_s14 }
 0x77b   : > { %p1838_p2 = pnand %p2712_p11, %p2711_p13 }
 0x77d   : > { %2097 = dma.done.wait (!%p1838_p2), %s1499_s27, 128  }
 0x77e   : > { %2099 = vsyncadd (!%p1838_p2), %s1499_s27, 4294967168  ;;  %s35_s30 = sadd.s32 1, %s2710_s22   ;;  %s2713_s11 = sld [smem:[#allocation16_spill]] }
 0x77f   : > { %p32_p5 = scmp.ge.s32.totalorder %s35_s30, 4   ;;  %s2714_s27 = sld [smem:[#allocation22_spill]] }
 0x780   : > { %s2715_s28 = sld [smem:[#allocation18_spill]]  ;;  %s2716_s29 = sld [smem:[#allocation20_spill]] }
 0x781   : > { %s2717_s25 = smov %s2106_s26  ;;  %34 = sbr.rel (!%p32_p5) target bundleno = 17 (0x11), region = 154 }
 0x784   : > { %s2718_s26 = smov %s2713_s11 }
 0x788   :  { %1504 = vsyncpa [#allocation3], 1 }
 0x789   :  { %1506 = vsyncpa [#allocation3 + $0x1], 1 }
 0x78a   :  { %1507 = vsyncpa [#allocation6], 1 }
 0x78b   :  { %1509 = vsyncpa [#allocation6 + $0x1], 1 }
 0x78c   :  { %1510 = vsyncpa [#allocation9], 1 }
 0x78d   :  { %1512 = vsyncpa [#allocation9 + $0x1], 1 }
 0x78e   :  { %1513 = vsyncpa [#allocation4], 1 }
 0x78f   :  { %1515 = vsyncpa [#allocation4 + $0x1], 1 }

</bundles_post_ra>
